<compile_context>
chip_gen: v7x
topology: tpu7x:2x2x1
jax: 0.10.0
libtpu: 0.0.40
codegen_flags: <defaults>
</compile_context>

<pallas_src>
import functools

import jax
import jax.numpy as jnp
from jax.experimental import pallas as pl
from jax.experimental.pallas import tpu as pltpu

# Module hyperparameters (HIDDEN_SIZE_LG / HIDDEN_SIZE_SM from the original config).
STATE_DIM = 16
HIDDEN_SIZE_LG = 64
HIDDEN_SIZE_SM = 32
ACTIONS_DIM = 4

NEG_SLOPE = 0.01      # F.leaky_relu default negative_slope

PACK = 8              # batch rows packed per slab row (8 * STATE_DIM = 128 lanes)
LANE_IN = PACK * STATE_DIM        # 128
LANE_H1 = PACK * HIDDEN_SIZE_LG   # 512
LANE_H2 = PACK * HIDDEN_SIZE_SM   # 256
LANE_OUT = PACK * ACTIONS_DIM     # 32
MAX_TB = 16384        # max batch rows per grid step (2048 slab rows, ~13 MiB live in VMEM)
MIN_BP = 128          # min padded batch: 16 slab rows -> native bf16 (16,128) tiling


def _leaky_relu(v):
    # slope < 1  =>  leaky_relu(v) == max(v, slope * v); 2 VALU ops instead of mul+cmp+select.
    return jnp.maximum(v, NEG_SLOPE * v)


def dqn_kernel(x_ref, w1_ref, b1_ref, w2_ref, b2_ref, w3_ref, b3_ref, o_ref):
    # x_ref: [rows, 128] bf16 slab; weights are 8-way block-diagonal bf16; biases f32.
    x = x_ref[...]
    h = jnp.dot(x, w1_ref[...], preferred_element_type=jnp.float32) + b1_ref[...]
    h = _leaky_relu(h).astype(jnp.bfloat16)
    h = jnp.dot(h, w2_ref[...], preferred_element_type=jnp.float32) + b2_ref[...]
    h = _leaky_relu(h).astype(jnp.bfloat16)
    h = jnp.dot(h, w3_ref[...], preferred_element_type=jnp.float32) + b3_ref[...]
    # NOTE: the original module applies LeakyReLU to the final (Q-value) layer as well.
    o_ref[...] = _leaky_relu(h).astype(o_ref.dtype)


def _round_up(a, m):
    return ((a + m - 1) // m) * m


@functools.lru_cache(maxsize=1)
def _num_tensorcores():
    """Best-effort: 2 TensorCores per chip on v7x, 1 on v5e/v6e. Falls back to 1."""
    try:
        kind = (jax.devices()[0].device_kind or "").lower()
    except Exception:
        return 1
    return 2 if "v7" in kind else 1


def _plan_batch(B, num_tc):
    """Return (padded batch Bp, batch tile tb); tb divides Bp, both multiples of MIN_BP."""
    if B > MAX_TB:
        # Large batch: fixed MAX_TB tiles; pad to a multiple of the tile (coarse retrace buckets).
        Bp = _round_up(B, MAX_TB)
        return Bp, MAX_TB
    # Small/medium batch: power-of-two buckets to limit retraces in variable-batch RL loops.
    Bp = MIN_BP
    while Bp < B:
        Bp *= 2
    if num_tc >= 2 and Bp >= 2 * MIN_BP:
        tb = Bp // 2          # 2 grid steps only when there are 2 TCs to shard across
    else:
        tb = Bp               # single-TC chips: one tile, zero extra per-step overhead
    return Bp, tb


def _block_diag(w, p):
    """[k, n] -> [p*k, p*n] block diagonal with p copies of w."""
    return jnp.kron(jnp.eye(p, dtype=w.dtype), w)


def pack_params(params):
    """One-time repack: block-diagonal bf16 weights + lane-tiled f32 biases. Cache the result."""
    w1, b1, w2, b2, w3, b3 = params
    w1b = _block_diag(w1, PACK).astype(jnp.bfloat16)
    w2b = _block_diag(w2, PACK).astype(jnp.bfloat16)
    w3b = _block_diag(w3, PACK).astype(jnp.bfloat16)
    b1b = jnp.tile(b1.reshape(1, -1), (1, PACK)).astype(jnp.float32)
    b2b = jnp.tile(b2.reshape(1, -1), (1, PACK)).astype(jnp.float32)
    b3b = jnp.tile(b3.reshape(1, -1), (1, PACK)).astype(jnp.float32)
    return (w1b, b1b, w2b, b2b, w3b, b3b)


@functools.partial(jax.jit, static_argnums=(2,))
def _forward_packed(x, packed, num_tc):
    """x: [B, STATE_DIM] float32, packed: output of pack_params. Returns [B, ACTIONS_DIM] f32."""
    w1b, b1b, w2b, b2b, w3b, b3b = packed
    B = x.shape[0]
    Bp, tb = _plan_batch(B, num_tc)
    if Bp != B:
        x = jnp.pad(x, ((0, Bp - B), (0, 0)))

    # Pack PACK batch rows per slab row (lane-dense input), cast streaming data to bf16.
    x_slab = x.astype(jnp.bfloat16).reshape(Bp // PACK, LANE_IN)

    rows = tb // PACK                 # slab rows per grid step (multiple of 16)
    grid = (Bp // tb,)

    out_slab = pl.pallas_call(
        dqn_kernel,
        out_shape=jax.ShapeDtypeStruct((Bp // PACK, LANE_OUT), jnp.bfloat16),
        grid_spec=pltpu.PrefetchScalarGridSpec(
            num_scalar_prefetch=0,
            grid=grid,
            in_specs=[
                pl.BlockSpec((rows, LANE_IN), lambda i: (i, 0)),       # x slab tile
                pl.BlockSpec((LANE_IN, LANE_H1), lambda i: (0, 0)),    # W1 (VMEM-resident)
                pl.BlockSpec((1, LANE_H1), lambda i: (0, 0)),          # b1
                pl.BlockSpec((LANE_H1, LANE_H2), lambda i: (0, 0)),    # W2
                pl.BlockSpec((1, LANE_H2), lambda i: (0, 0)),          # b2
                pl.BlockSpec((LANE_H2, LANE_OUT), lambda i: (0, 0)),   # W3
                pl.BlockSpec((1, LANE_OUT), lambda i: (0, 0)),         # b3
            ],
            out_specs=pl.BlockSpec((rows, LANE_OUT), lambda i: (i, 0)),
        ),
        compiler_params=pltpu.CompilerParams(
            dimension_semantics=("parallel",),
            vmem_limit_bytes=32 * 1024 * 1024,
        ),
    )(x_slab, w1b, b1b, w2b, b2b, w3b, b3b)

    # Unpack the slab back to [Bp, ACTIONS_DIM], drop padding rows, return f32 Q-values.
    return out_slab.reshape(Bp, ACTIONS_DIM)[:B].astype(jnp.float32)


def dqn_forward(x, packed_params):
    """Public forward. x: [B, STATE_DIM] (or [STATE_DIM]). packed_params from pack_params()."""
    if x.ndim == 1:
        x = x[None, :]
    return _forward_packed(x, packed_params, _num_tensorcores())


def init_params(key):
    """Deterministic init mimicking nn.Linear shapes (stored as [in, out])."""
    ks = jax.random.split(key, 6)

    def linear(kw, kb, fan_in, fan_out):
        bound = 1.0 / jnp.sqrt(fan_in)
        w = jax.random.uniform(kw, (fan_in, fan_out), jnp.float32, -bound, bound)
        b = jax.random.uniform(kb, (1, fan_out), jnp.float32, -bound, bound)
        return w, b

    w1, b1 = linear(ks[0], ks[1], STATE_DIM, HIDDEN_SIZE_LG)
    w2, b2 = linear(ks[2], ks[3], HIDDEN_SIZE_LG, HIDDEN_SIZE_SM)
    w3, b3 = linear(ks[4], ks[5], HIDDEN_SIZE_SM, ACTIONS_DIM)
    return (w1, b1, w2, b2, w3, b3)


def dqn_forward_ref_mirror(x, params):
    """Pure-JAX reference mirroring the kernel's dtype choices (bf16 data, f32 accum, bf16 out)."""
    w1, b1, w2, b2, w3, b3 = params
    h = x.astype(jnp.bfloat16)
    for w, b in ((w1, b1), (w2, b2), (w3, b3)):
        h = _leaky_relu(jnp.dot(h, w.astype(jnp.bfloat16),
                                preferred_element_type=jnp.float32) + b)
        h = h.astype(jnp.bfloat16)
    return h.astype(jnp.float32)


def dqn_forward_ref_f32(x, params):
    """Full-f32 reference matching the original PyTorch module (sanity check for bf16 drift)."""
    w1, b1, w2, b2, w3, b3 = params
    h = x
    for w, b in ((w1, b1), (w2, b2), (w3, b3)):
        h = _leaky_relu(jnp.dot(h, w) + b)
    return h


if __name__ == "__main__":
    key = jax.random.PRNGKey(0)
    k_x, k_x2, k_p = jax.random.split(key, 3)
    params = init_params(k_p)
    packed = pack_params(params)          # one-time weight repack (cached across calls)

    # Small, deterministic smoke test (single-tile path).
    B = 2
    x = jax.random.normal(k_x, (B, STATE_DIM), jnp.float32)
    out = jax.block_until_ready(dqn_forward(x, packed))
    ref = dqn_forward_ref_mirror(x, params)
    ref32 = dqn_forward_ref_f32(x, params)
    assert out.shape == (B, ACTIONS_DIM)
    assert jnp.allclose(out, ref, atol=2e-3, rtol=2e-3), "mismatch vs bf16-mirrored ref (B=2)"
    assert jnp.allclose(out, ref32, atol=1e-1, rtol=1e-1), "gross mismatch vs f32 ref (B=2)"

    # Multi-tile / padding path sanity check.
    B2 = 200
    x2 = jax.random.normal(k_x2, (B2, STATE_DIM), jnp.float32)
    out2 = jax.block_until_ready(dqn_forward(x2, packed))
    ref2 = dqn_forward_ref_mirror(x2, params)
    assert out2.shape == (B2, ACTIONS_DIM)
    assert jnp.allclose(out2, ref2, atol=2e-3, rtol=2e-3), "mismatch vs bf16-mirrored ref (B=200)"

    # TODO(synk): _feature_prep / choose_action / epsilon-gamma bookkeeping are pandas +
    # host-side control flow with no Pallas equivalent; only the forward pass is a kernel.
    print("KERNEL_OK")
</pallas_src>

<mosaic_0001>
module attributes {stable_mosaic.version = 11 : i64} {
  func.func @dqn_kernel(%arg0: i32, %arg1: memref<16x128xbf16, #tpu.memory_space<vmem>>, %arg2: memref<128x512xbf16, #tpu.memory_space<vmem>>, %arg3: memref<1x512xf32, #tpu.memory_space<vmem>>, %arg4: memref<512x256xbf16, #tpu.memory_space<vmem>>, %arg5: memref<1x256xf32, #tpu.memory_space<vmem>>, %arg6: memref<256x32xbf16, #tpu.memory_space<vmem>>, %arg7: memref<1x32xf32, #tpu.memory_space<vmem>>, %arg8: memref<16x32xbf16, #tpu.memory_space<vmem>>) attributes {dimension_semantics = [#tpu.dimension_semantics<parallel>], iteration_bounds = array<i64: 1>, scalar_prefetch = 0 : i64, scratch_operands = 0 : i64, tpu.core_type = #tpu.core_type<tc>, window_params = [{transform_indices = @transform_0, window_bounds = array<i64: 16, 128>}, {pipeline_mode = #tpu.pipeline_mode<synchronous>, transform_indices = @transform_1, window_bounds = array<i64: 128, 512>}, {pipeline_mode = #tpu.pipeline_mode<synchronous>, transform_indices = @transform_2, window_bounds = array<i64: 1, 512>}, {pipeline_mode = #tpu.pipeline_mode<synchronous>, transform_indices = @transform_3, window_bounds = array<i64: 512, 256>}, {pipeline_mode = #tpu.pipeline_mode<synchronous>, transform_indices = @transform_4, window_bounds = array<i64: 1, 256>}, {pipeline_mode = #tpu.pipeline_mode<synchronous>, transform_indices = @transform_5, window_bounds = array<i64: 256, 32>}, {pipeline_mode = #tpu.pipeline_mode<synchronous>, transform_indices = @transform_6, window_bounds = array<i64: 1, 32>}, {transform_indices = @transform_7, window_bounds = array<i64: 16, 32>}]} {
    %c0 = arith.constant 0 : index
    %c0_0 = arith.constant 0 : index
    %0 = vector.load %arg1[%c0, %c0_0] : memref<16x128xbf16, #tpu.memory_space<vmem>>, vector<16x128xbf16>
    %c0_1 = arith.constant 0 : index
    %c0_2 = arith.constant 0 : index
    %1 = vector.load %arg2[%c0_1, %c0_2] : memref<128x512xbf16, #tpu.memory_space<vmem>>, vector<128x512xbf16>
    %cst = arith.constant dense<0.000000e+00> : vector<16x512xf32>
    %2 = tpu.matmul %0, %1, %cst {dimension_numbers = #tpu.dot_dimension_numbers<[1], [0], [0], [1], [0, 0, 1, 1], [], []>} : vector<16x128xbf16>, vector<128x512xbf16>, vector<16x512xf32> -> vector<16x512xf32>
    %c0_3 = arith.constant 0 : index
    %c0_4 = arith.constant 0 : index
    %3 = vector.load %arg3[%c0_3, %c0_4] : memref<1x512xf32, #tpu.memory_space<vmem>>, vector<1x512xf32>
    %4 = vector.broadcast %3 : vector<1x512xf32> to vector<16x512xf32>
    %5 = arith.addf %2, %4 : vector<16x512xf32>
    %cst_5 = arith.constant 0.00999999977 : f32
    %6 = vector.broadcast %cst_5 : f32 to vector<16x512xf32>
    %7 = arith.mulf %6, %5 : vector<16x512xf32>
    %8 = arith.maximumf %5, %7 : vector<16x512xf32>
    %9 = arith.truncf %8 : vector<16x512xf32> to vector<16x512xbf16>
    %c0_6 = arith.constant 0 : index
    %c0_7 = arith.constant 0 : index
    %10 = vector.load %arg4[%c0_6, %c0_7] : memref<512x256xbf16, #tpu.memory_space<vmem>>, vector<512x256xbf16>
    %cst_8 = arith.constant dense<0.000000e+00> : vector<16x256xf32>
    %11 = tpu.matmul %9, %10, %cst_8 {dimension_numbers = #tpu.dot_dimension_numbers<[1], [0], [0], [1], [0, 0, 1, 1], [], []>} : vector<16x512xbf16>, vector<512x256xbf16>, vector<16x256xf32> -> vector<16x256xf32>
    %c0_9 = arith.constant 0 : index
    %c0_10 = arith.constant 0 : index
    %12 = vector.load %arg5[%c0_9, %c0_10] : memref<1x256xf32, #tpu.memory_space<vmem>>, vector<1x256xf32>
    %13 = vector.broadcast %12 : vector<1x256xf32> to vector<16x256xf32>
    %14 = arith.addf %11, %13 : vector<16x256xf32>
    %cst_11 = arith.constant 0.00999999977 : f32
    %15 = vector.broadcast %cst_11 : f32 to vector<16x256xf32>
    %16 = arith.mulf %15, %14 : vector<16x256xf32>
    %17 = arith.maximumf %14, %16 : vector<16x256xf32>
    %18 = arith.truncf %17 : vector<16x256xf32> to vector<16x256xbf16>
    %c0_12 = arith.constant 0 : index
    %c0_13 = arith.constant 0 : index
    %19 = vector.load %arg6[%c0_12, %c0_13] : memref<256x32xbf16, #tpu.memory_space<vmem>>, vector<256x32xbf16>
    %cst_14 = arith.constant dense<0.000000e+00> : vector<16x32xf32>
    %20 = tpu.matmul %18, %19, %cst_14 {dimension_numbers = #tpu.dot_dimension_numbers<[1], [0], [0], [1], [0, 0, 1, 1], [], []>} : vector<16x256xbf16>, vector<256x32xbf16>, vector<16x32xf32> -> vector<16x32xf32>
    %c0_15 = arith.constant 0 : index
    %c0_16 = arith.constant 0 : index
    %21 = vector.load %arg7[%c0_15, %c0_16] : memref<1x32xf32, #tpu.memory_space<vmem>>, vector<1x32xf32>
    %22 = vector.broadcast %21 : vector<1x32xf32> to vector<16x32xf32>
    %23 = arith.addf %20, %22 : vector<16x32xf32>
    %cst_17 = arith.constant 0.00999999977 : f32
    %24 = vector.broadcast %cst_17 : f32 to vector<16x32xf32>
    %25 = arith.mulf %24, %23 : vector<16x32xf32>
    %26 = arith.maximumf %23, %25 : vector<16x32xf32>
    %27 = arith.truncf %26 : vector<16x32xf32> to vector<16x32xbf16>
    %c0_18 = arith.constant 0 : index
    %c0_19 = arith.constant 0 : index
    %28 = vector.load %arg8[%c0_18, %c0_19] : memref<16x32xbf16, #tpu.memory_space<vmem>>, vector<16x32xbf16>
    tpu.vector_store %arg8[%c0_18, %c0_19], %27 {strides = array<i32>} : memref<16x32xbf16, #tpu.memory_space<vmem>>, vector<16x32xbf16>,
    return
  }
  func.func @transform_0(%arg0: i32) -> (i32, i32) {
    %c0_i32 = arith.constant 0 : i32
    %c0_i32_0 = arith.constant 0 : i32
    return %arg0, %c0_i32 : i32, i32
  }
  func.func @transform_1(%arg0: i32) -> (i32, i32) {
    %c0_i32 = arith.constant 0 : i32
    %c0_i32_0 = arith.constant 0 : i32
    %c0_i32_1 = arith.constant 0 : i32
    return %c0_i32, %c0_i32_0 : i32, i32
  }
  func.func @transform_2(%arg0: i32) -> (i32, i32) {
    %c0_i32 = arith.constant 0 : i32
    %c0_i32_0 = arith.constant 0 : i32
    %c0_i32_1 = arith.constant 0 : i32
    return %c0_i32, %c0_i32_0 : i32, i32
  }
  func.func @transform_3(%arg0: i32) -> (i32, i32) {
    %c0_i32 = arith.constant 0 : i32
    %c0_i32_0 = arith.constant 0 : i32
    %c0_i32_1 = arith.constant 0 : i32
    return %c0_i32, %c0_i32_0 : i32, i32
  }
  func.func @transform_4(%arg0: i32) -> (i32, i32) {
    %c0_i32 = arith.constant 0 : i32
    %c0_i32_0 = arith.constant 0 : i32
    %c0_i32_1 = arith.constant 0 : i32
    return %c0_i32, %c0_i32_0 : i32, i32
  }
  func.func @transform_5(%arg0: i32) -> (i32, i32) {
    %c0_i32 = arith.constant 0 : i32
    %c0_i32_0 = arith.constant 0 : i32
    %c0_i32_1 = arith.constant 0 : i32
    return %c0_i32, %c0_i32_0 : i32, i32
  }
  func.func @transform_6(%arg0: i32) -> (i32, i32) {
    %c0_i32 = arith.constant 0 : i32
    %c0_i32_0 = arith.constant 0 : i32
    %c0_i32_1 = arith.constant 0 : i32
    return %c0_i32, %c0_i32_0 : i32, i32
  }
  func.func @transform_7(%arg0: i32) -> (i32, i32) {
    %c0_i32 = arith.constant 0 : i32
    %c0_i32_0 = arith.constant 0 : i32
    return %arg0, %c0_i32 : i32, i32
  }
}

</mosaic_0001>

<bundles_post_ra>
// kernel: _forward_packed.1
= control target key start
LH: loop header
LB: loop body
LE: loop exit
PB: predicated region body
PF: predicated region fallthrough
CT: control target
= control target key end

     0   :  { %12 = vsyncpa [#allocation3], 0  ;;  %s1394_s24 = smov [#allocation2]   ;;  %s1630_s0 = inlined_call_operand.vmem [shape: bf16[16,128], index: 0, kind: input, shape index: {}]   ;;  %s1631_s1 = inlined_call_operand.vmem [shape: bf16[128,512], index: 1, kind: input, shape index: {}]   ;;  %s1632_s2 = inlined_call_operand.vmem [shape: f32[1,512], index: 2, kind: input, shape index: {}]   ;;  %s1633_s3 = inlined_call_operand.hbm [shape: bf16[512,256], index: 3, kind: input, shape index: {}]   ;;  %s1634_s4 = inlined_call_operand.vmem [shape: f32[1,256], index: 4, kind: input, shape index: {}]   ;;  %s1635_s5 = inlined_call_operand.vmem [shape: bf16[256,32], index: 5, kind: input, shape index: {}]   ;;  %s1636_s6 = inlined_call_operand.vmem [shape: f32[1,32], index: 6, kind: input, shape index: {}]   ;;  %s1637_s7 = inlined_call_operand.vmem [shape: bf16[16,32], index: 7, kind: output, shape index: {}]  }
   0x1   :  { %s24_s25 = sshll.u32 %s1394_s24, 4  ;;  %s1370_s28 = scalar_lea.hbm %s1633_s3, 8192  ;;  %s25_s25 = int_to_ptr.vmem [resolvable:$true] %s24_s25 }
   0x2   :  { %p1371_p0 = scmp.ne.s32.totalorder %s1633_s3, %s1370_s28  ;;  %p1374_p1 = scmp.lt.u32.totalorder %s1370_s28, %s1633_s3 }
   0x4   :  { %p1376_p2 = pnand %p1374_p1, %p1371_p0 }
   0x6   :  { %1379 = shalt.err (!%p1376_p2)
}
   0x7   :  { %s1380_s10 = scalar_lea.vmem %s25_s25, 8192  ;;  %p1385_p4 = scmp.lt.s32.totalorder %s25_s25, %s25_s25 }
   0x8   :  { %p1381_p3 = scmp.ne.s32.totalorder %s25_s25, %s1380_s10  ;;  %p1386_p5 = scmp.lt.s32.totalorder %s1380_s10, %s1380_s10 }
   0xa   :  { %p1387_p6 = por %p1386_p5, %p1385_p4 }
   0xc   :  { %p1388_p7 = pnand %p1387_p6, %p1381_p3 }
   0xe   :  { %1391 = shalt.err (!%p1388_p7)
}
   0xf   :  { %s1395_s11 = smov 128   ;;  %s1396_s12 = smov 8  }
  0x10   :  { %30 = dma.hbm_to_vmem [thread:$0]  %s1633_s3, 8192, %s25_s25, [#allocation3], %s1395_s11, %s1395_s11, %s1396_s12  }
  0x11   :  { %1392 = dma.done.wait [#allocation3], 8192  }
  0x12   :  { %1393 = vsyncadd [#allocation3], 4294959104  ;;  %v1397_v0 = vmov 0   ;;  %v1209_v1 = vld [vmem:[%s1631_s1 + $0x4] ss:$16 sps:$4 sm:$0xff]   ;;  %vm1049_vm0 = vcmask 257024  }
  0x13   :  { %295 = vmatprep.mubr.bf16.mxu1 %v1397_v0  ;;  %v1211_v2 = vld [vmem:[%s1631_s1] ss:$16 sps:$4 sm:$0xff]   ;;  %263 = vmatprep.subr.bf16.mxu1 %v1209_v1  ;;  %v1212_v3 = vld [vmem:[%s1631_s1 + $0x24] ss:$16 sps:$4 sm:$0xff]   ;;  %v1236_v22 = vld [vmem:[%s1631_s1 + $0xc] ss:$16 sps:$4 sm:$0xff]  }
  0x14   :  { %264 = vmatpush1.bf16.msra.mxu1 %v1211_v2  ;;  %v1214_v4 = vld [vmem:[%s1631_s1 + $0x20] ss:$16 sps:$4 sm:$0xff]   ;;  %v1215_v5 = vld [vmem:[%s1631_s1 + $0x44] ss:$16 sps:$4 sm:$0xff]   ;;  %v1234_v25 = vld [vmem:[%s1631_s1 + $0x8] ss:$16 sps:$4 sm:$0xff]  }
  0x15   :  { %265 = vmatprep.subr.bf16.mxu1 %v1212_v3  ;;  %v1217_v6 = vld [vmem:[%s1631_s1 + $0x40] ss:$16 sps:$4 sm:$0xff]   ;;  %v1218_v7 = vld [vmem:[%s1631_s1 + $0x64] ss:$16 sps:$4 sm:$0xff]   ;;  %v1239_v26 = vld [vmem:[%s1631_s1 + $0x2c] ss:$16 sps:$4 sm:$0xff]  }
  0x16   :  { %v1220_v8 = vld [vmem:[%s1631_s1 + $0x60] ss:$16 sps:$4 sm:$0xff]   ;;  %v1221_v9 = vld [vmem:[%s1631_s1 + $0x84] ss:$16 sps:$4 sm:$0xff]   ;;  %v1237_v29 = vld [vmem:[%s1631_s1 + $0x28] ss:$16 sps:$4 sm:$0xff]  }
  0x17   :  { %v1223_v10 = vld [vmem:[%s1631_s1 + $0x80] ss:$16 sps:$4 sm:$0xff]   ;;  %v1224_v11 = vld [vmem:[%s1631_s1 + $0xa4] ss:$16 sps:$4 sm:$0xff]   ;;  %v1242_v31 = vld [vmem:[%s1631_s1 + $0x4c] ss:$16 sps:$4 sm:$0xff]  }
  0x18   :  { %266 = vmatpush1.bf16.msra.mxu1 %v1214_v4  ;;  %v1226_v12 = vld [vmem:[%s1631_s1 + $0xa0] ss:$16 sps:$4 sm:$0xff]   ;;  %v1227_v13 = vld [vmem:[%s1631_s1 + $0xc4] ss:$16 sps:$4 sm:$0xff]   ;;  %v1240_v33 = vld [vmem:[%s1631_s1 + $0x48] ss:$16 sps:$4 sm:$0xff]  }
  0x19   :  { %267 = vmatprep.subr.bf16.mxu1 %v1215_v5  ;;  %v1229_v14 = vld [vmem:[%s1631_s1 + $0xc0] ss:$16 sps:$4 sm:$0xff]   ;;  %v1258_v15 = vld [vmem:[#allocation2 + $0x4] ss:$8 sps:$4 sm:$0xff]   ;;  %v1261_v18 = vld [vmem:[#allocation2 + $0x14] ss:$8 sps:$4 sm:$0xff]  }
  0x1a   :  { %v1260_v16 = vld [vmem:[#allocation2] ss:$8 sps:$4 sm:$0xff]   ;;  %v1230_v17 = vld [vmem:[%s1631_s1 + $0xe4] ss:$16 sps:$4 sm:$0xff]   ;;  %765 = vmatprep.subr.bf16.mxu0 %v1258_v15  ;;  %v1263_v19 = vld [vmem:[#allocation2 + $0x10] ss:$8 sps:$4 sm:$0xff]  }
  0x1b   :  { %766 = vmatpush1.bf16.msra.mxu0 %v1260_v16  ;;  %v1232_v20 = vld [vmem:[%s1631_s1 + $0xe0] ss:$16 sps:$4 sm:$0xff]   ;;  %v1264_v21 = vld [vmem:[#allocation2 + $0x24] ss:$8 sps:$4 sm:$0xff]   ;;  %v1267_v27 = vld [vmem:[#allocation2 + $0x34] ss:$8 sps:$4 sm:$0xff]  }
  0x1c   :  { %268 = vmatpush1.bf16.msra.mxu1 %v1217_v6  ;;  %767 = vmatprep.subr.bf16.mxu0 %v1261_v18  ;;  %v1504_v23 = vld [vmem:[%s1630_s0] sm:$0xff]   ;;  %v1269_v28 = vld [vmem:[#allocation2 + $0x30] ss:$8 sps:$4 sm:$0xff]   ;;  %v1245_v34 = vld [vmem:[%s1631_s1 + $0x6c] ss:$16 sps:$4 sm:$0xff]  }
  0x1d   :  { %269 = vmatprep.subr.bf16.mxu1 %v1218_v7  ;;  %v1266_v24 = vld [vmem:[#allocation2 + $0x20] ss:$8 sps:$4 sm:$0xff]   ;;  %v1270_v30 = vld [vmem:[#allocation2 + $0x44] ss:$8 sps:$4 sm:$0xff]   ;;  %v1273_v35 = vld [vmem:[#allocation2 + $0x54] ss:$8 sps:$4 sm:$0xff]  }
  0x1e   :  { %v1272_v32 = vld [vmem:[#allocation2 + $0x40] ss:$8 sps:$4 sm:$0xff]   ;;  %v1275_v36 = vld [vmem:[#allocation2 + $0x50] ss:$8 sps:$4 sm:$0xff]   ;;  %v1276_v38 = vld [vmem:[#allocation2 + $0x64] ss:$8 sps:$4 sm:$0xff]  }
  0x1f   :  { %768 = vmatpush1.bf16.msra.mxu0 %v1263_v19  ;;  %v1243_v37 = vld [vmem:[%s1631_s1 + $0x68] ss:$16 sps:$4 sm:$0xff]   ;;  %v1248_v39 = vld [vmem:[%s1631_s1 + $0x8c] ss:$16 sps:$4 sm:$0xff]   ;;  %v1354_v3 = vld [vmem:[%s1635_s5 + $0x40] sm:$0xff]  }
  0x20   :  { %270 = vmatpush1.bf16.msra.mxu1 %v1220_v8  ;;  %769 = vmatprep.subr.bf16.mxu0 %v1264_v21  ;;  %v1278_v40 = vld [vmem:[#allocation2 + $0x60] ss:$8 sps:$4 sm:$0xff]   ;;  %v1279_v42 = vld [vmem:[#allocation2 + $0x74] ss:$8 sps:$4 sm:$0xff]   ;;  %v1281_v44 = vld [vmem:[#allocation2 + $0x70] ss:$8 sps:$4 sm:$0xff]  }
  0x21   :  { %271 = vmatprep.subr.bf16.mxu1 %v1221_v9  ;;  %v1246_v41 = vld [vmem:[%s1631_s1 + $0x88] ss:$16 sps:$4 sm:$0xff]   ;;  %v1251_v43 = vld [vmem:[%s1631_s1 + $0xac] ss:$16 sps:$4 sm:$0xff]   ;;  %v1355_v4 = vld [vmem:[%s1635_s5] sm:$0xff]  }
  0x22   :  { %v1249_v45 = vld [vmem:[%s1631_s1 + $0xa8] ss:$16 sps:$4 sm:$0xff]   ;;  %v1282_v46 = vld [vmem:[#allocation2 + $0x84] ss:$8 sps:$4 sm:$0xff]   ;;  %v1285_v50 = vld [vmem:[#allocation2 + $0x94] ss:$8 sps:$4 sm:$0xff]  }
  0x23   :  { %770 = vmatpush1.bf16.msra.mxu0 %v1266_v24  ;;  %v1254_v47 = vld [vmem:[%s1631_s1 + $0xcc] ss:$16 sps:$4 sm:$0xff]   ;;  %v1284_v48 = vld [vmem:[#allocation2 + $0x80] ss:$8 sps:$4 sm:$0xff]   ;;  %v1287_v52 = vld [vmem:[#allocation2 + $0x90] ss:$8 sps:$4 sm:$0xff]  }
  0x24   :  { %272 = vmatpush1.bf16.msra.mxu1 %v1223_v10  ;;  %771 = vmatprep.subr.bf16.mxu0 %v1267_v27  ;;  %v1252_v49 = vld [vmem:[%s1631_s1 + $0xc8] ss:$16 sps:$4 sm:$0xff]   ;;  %v1257_v51 = vld [vmem:[%s1631_s1 + $0xec] ss:$16 sps:$4 sm:$0xff]   ;;  %v1358_v7 = vld [vmem:[%s1635_s5 + $0x50] sm:$0xff]  }
  0x25   :  { %273 = vmatprep.subr.bf16.mxu1 %v1224_v11  ;;  %v1255_v53 = vld [vmem:[%s1631_s1 + $0xe8] ss:$16 sps:$4 sm:$0xff]   ;;  %v1288_v54 = vld [vmem:[#allocation2 + $0xa4] ss:$8 sps:$4 sm:$0xff]   ;;  %v1291_v56 = vld [vmem:[#allocation2 + $0xb4] ss:$8 sps:$4 sm:$0xff]  }
  0x26   :  { %v1290_v55 = vld [vmem:[#allocation2 + $0xa0] ss:$8 sps:$4 sm:$0xff]   ;;  %v1293_v57 = vld [vmem:[#allocation2 + $0xb0] ss:$8 sps:$4 sm:$0xff]   ;;  %v1294_v58 = vld [vmem:[#allocation2 + $0xc4] ss:$8 sps:$4 sm:$0xff]  }
  0x27   :  { %772 = vmatpush1.bf16.msra.mxu0 %v1269_v28  ;;  %v1296_v59 = vld [vmem:[#allocation2 + $0xc0] ss:$8 sps:$4 sm:$0xff]   ;;  %v1297_v60 = vld [vmem:[#allocation2 + $0xd4] ss:$8 sps:$4 sm:$0xff]   ;;  %v1299_v61 = vld [vmem:[#allocation2 + $0xd0] ss:$8 sps:$4 sm:$0xff]  }
  0x28   :  { %274 = vmatpush1.bf16.msra.mxu1 %v1226_v12  ;;  %773 = vmatprep.subr.bf16.mxu0 %v1270_v30  ;;  %v1300_v62 = vld [vmem:[#allocation2 + $0xe4] ss:$8 sps:$4 sm:$0xff]   ;;  %v1302_v63 = vld [vmem:[#allocation2 + $0xe0] ss:$8 sps:$4 sm:$0xff]   ;;  %v1305_v1 = vld [vmem:[#allocation2 + $0xf0] ss:$8 sps:$4 sm:$0xff]  }
  0x29   :  { %275 = vmatprep.subr.bf16.mxu1 %v1227_v13  ;;  %v1308_v2 = vld [vmem:[#allocation2 + $0x104] ss:$8 sps:$4 sm:$0xff]   ;;  %v1359_v8 = vld [vmem:[%s1635_s5 + $0x10] sm:$0xff]   ;;  %v1360_v9 = vld [vmem:[%s1635_s5 + $0x58] sm:$0xff]   ;;  %v77_v13 = vlaneseq }
  0x2a   :  { %v1356_v5 = vld [vmem:[%s1635_s5 + $0x48] sm:$0xff]   ;;  %v1361_v10 = vld [vmem:[%s1635_s5 + $0x18] sm:$0xff]   ;;  %v1362_v11 = vld [vmem:[%s1635_s5 + $0x60] sm:$0xff]  }
  0x2b   :  { %774 = vmatpush1.bf16.msra.mxu0 %v1272_v32  ;;  %v1357_v6 = vld [vmem:[%s1635_s5 + $0x8] sm:$0xff]   ;;  %v1363_v12 = vld [vmem:[%s1635_s5 + $0x20] sm:$0xff]  }
  0x2c   :  { %276 = vmatpush1.bf16.msra.mxu1 %v1229_v14  ;;  %775 = vmatprep.subr.bf16.mxu0 %v1273_v35  ;;  %v1583_v14 = vshrl.u32 %v77_v13, 7  ;;  %v75_v16 = vld [vmem:[%s1632_s2] sm:$0xf]  ;;  %v1335_v13 = vld [vmem:[#allocation2 + $0x194] ss:$8 sps:$4 sm:$0xff]  }
  0x2d   :  { %277 = vmatprep.subr.bf16.mxu1 %v1230_v17 }
  0x2e   :  { %v79_v15 = vsub.s32 0, %v1583_v14  ;;  %v83_v17 = vsub.s32 1, %v1583_v14 }
  0x2f   :  { %776 = vmatpush1.bf16.msra.mxu0 %v1275_v36 }
  0x30   :  { %278 = vmatpush1.bf16.msra.mxu1 %v1232_v20  ;;  %777 = vmatprep.subr.bf16.mxu0 %v1276_v38  ;;  %v80_v18 = vrot.slane %v75_v16, %v79_v15  ;;  %v84_v19 = vrot.slane %v75_v16, %v83_v17  ;;  %v1306_v38 = vld [vmem:[#allocation2 + $0x100] ss:$8 sps:$4 sm:$0xff]  }
  0x31   :  { %306 = vmatprep.subr.bf16.mxu1 %v1236_v22 }
  0x33   :  { %296 = vmatmul.mubr.bf16.vlgmr.msra.gmra.mrb[0].mxu1 %v1504_v23  ;;  %778 = vmatpush1.bf16.msra.mxu0 %v1278_v40  ;;  %v1309_v40 = vld [vmem:[#allocation2 + $0x110] ss:$8 sps:$4 sm:$0xff]  }
  0x34   :  { %307 = vmatpush1.bf16.msra.mxu1 %v1234_v25  ;;  %338 = vmatprep.mubr.bf16.mxu1 %v1397_v0  ;;  %v1303_v0 = vld [vmem:[#allocation2 + $0xf4] ss:$8 sps:$4 sm:$0xff]  }
  0x35   :  { %308 = vmatprep.subr.bf16.mxu1 %v1239_v26  ;;  %779 = vmatprep.subr.bf16.mxu0 %v1279_v42  ;;  %v1312_v42 = vld [vmem:[#allocation2 + $0x120] ss:$8 sps:$4 sm:$0xff]  }
  0x37   :  { %780 = vmatpush1.bf16.msra.mxu0 %v1281_v44  ;;  %v1315_v44 = vld [vmem:[#allocation2 + $0x130] ss:$8 sps:$4 sm:$0xff]  }
  0x38   :  { %309 = vmatpush1.bf16.msra.mxu1 %v1237_v29  ;;  %781 = vmatprep.subr.bf16.mxu0 %v1282_v46  ;;  %v87_v46 = vsub.s32 2, %v1583_v14 }
  0x39   :  { %310 = vmatprep.subr.bf16.mxu1 %v1242_v31 }
  0x3b   :  { %782 = vmatpush1.bf16.msra.mxu0 %v1284_v48  ;;  %v91_v48 = vsub.s32 3, %v1583_v14 }
  0x3c   :  { %311 = vmatpush1.bf16.msra.mxu1 %v1240_v33  ;;  %783 = vmatprep.subr.bf16.mxu0 %v1285_v50  ;;  %v88_v50 = vrot.slane %v75_v16, %v87_v46 }
  0x3d   :  { %312 = vmatprep.subr.bf16.mxu1 %v1245_v34 }
  0x3f   :  { %784 = vmatpush1.bf16.msra.mxu0 %v1287_v52  ;;  %v92_v52 = vrot.slane %v75_v16, %v91_v48  ;;  %v1333_v16 = vld [vmem:[#allocation2 + $0x190] ss:$8 sps:$4 sm:$0xff]  }
  0x40   :  { %313 = vmatpush1.bf16.msra.mxu1 %v1243_v37  ;;  %785 = vmatprep.subr.bf16.mxu0 %v1288_v54 }
  0x41   :  { %314 = vmatprep.subr.bf16.mxu1 %v1248_v39  ;;  %v1311_v39 = vld [vmem:[#allocation2 + $0x114] ss:$8 sps:$4 sm:$0xff]  }
  0x43   :  { %786 = vmatpush1.bf16.msra.mxu0 %v1290_v55 }
  0x44   :  { %315 = vmatpush1.bf16.msra.mxu1 %v1246_v41  ;;  %787 = vmatprep.subr.bf16.mxu0 %v1291_v56  ;;  %v1314_v41 = vld [vmem:[#allocation2 + $0x124] ss:$8 sps:$4 sm:$0xff]  }
  0x45   :  { %316 = vmatprep.subr.bf16.mxu1 %v1251_v43  ;;  %v1317_v43 = vld [vmem:[#allocation2 + $0x134] ss:$8 sps:$4 sm:$0xff]  }
  0x47   :  { %788 = vmatpush1.bf16.msra.mxu0 %v1293_v57  ;;  %v1324_v57 = vld [vmem:[#allocation2 + $0x160] ss:$8 sps:$4 sm:$0xff]  }
  0x48   :  { %317 = vmatpush1.bf16.msra.mxu1 %v1249_v45  ;;  %789 = vmatprep.subr.bf16.mxu0 %v1294_v58  ;;  %v1320_v45 = vld [vmem:[#allocation2 + $0x144] ss:$8 sps:$4 sm:$0xff]  }
  0x49   :  { %318 = vmatprep.subr.bf16.mxu1 %v1254_v47  ;;  %v1318_v47 = vld [vmem:[#allocation2 + $0x140] ss:$8 sps:$4 sm:$0xff]  }
  0x4b   :  { %790 = vmatpush1.bf16.msra.mxu0 %v1296_v59 }
  0x4c   :  { %319 = vmatpush1.bf16.msra.mxu1 %v1252_v49  ;;  %791 = vmatprep.subr.bf16.mxu0 %v1297_v60  ;;  %v1323_v49 = vld [vmem:[#allocation2 + $0x154] ss:$8 sps:$4 sm:$0xff]  }
  0x4d   :  { %320 = vmatprep.subr.bf16.mxu1 %v1257_v51  ;;  %v1321_v51 = vld [vmem:[#allocation2 + $0x150] ss:$8 sps:$4 sm:$0xff]   ;;  %v1329_v60 = vld [vmem:[#allocation2 + $0x174] ss:$8 sps:$4 sm:$0xff]  }
  0x4f   :  { %792 = vmatpush1.bf16.msra.mxu0 %v1299_v61 }
  0x50   :  { %321 = vmatpush1.bf16.msra.mxu1 %v1255_v53  ;;  %793 = vmatprep.subr.bf16.mxu0 %v1300_v62  ;;  %v1326_v53 = vld [vmem:[#allocation2 + $0x164] ss:$8 sps:$4 sm:$0xff]  }
  0x51   :  { %1175 = vmatprep.subr.bf16.mxu1 %v1354_v3 }
  0x53   :  { %339 = vmatmul.mubr.bf16.vlgmr.msra.gmra.mrb[4].mxu1 %v1504_v23  ;;  %794 = vmatpush1.bf16.msra.mxu0 %v1302_v63 }
  0x54   :  { %795 = vmatprep.subr.bf16.mxu0 %v1303_v0  ;;  %1176 = vmatpush3.bf16.msra.mxu1 %v1355_v4  ;;  %v1327_v4 = vld [vmem:[#allocation2 + $0x170] ss:$8 sps:$4 sm:$0xff]  }
  0x55   :  { %1177 = vmatprep.subr.bf16.mxu1 %v1356_v5 }
  0x57   :  { %796 = vmatpush1.bf16.msra.mxu0 %v1305_v1 }
  0x58   :  { %808 = vmatprep.subr.bf16.mxu0 %v1308_v2  ;;  %1178 = vmatpush3.bf16.msra.mxu1 %v1357_v6 }
  0x59   :  { %1179 = vmatprep.subr.bf16.mxu1 %v1358_v7  ;;  %v1332_v7 = vld [vmem:[#allocation2 + $0x184] ss:$8 sps:$4 sm:$0xff]  }
  0x5c   :  { %1180 = vmatpush3.bf16.msra.mxu1 %v1359_v8 }
  0x5d   :  { %1181 = vmatprep.subr.bf16.mxu1 %v1360_v9 }
  0x60   :  { %1182 = vmatpush3.bf16.msra.mxu1 %v1361_v10 }
  0x61   :  { %1183 = vmatprep.subr.bf16.mxu1 %v1362_v11  ;;  %v1330_v11 = vld [vmem:[#allocation2 + $0x180] ss:$8 sps:$4 sm:$0xff]  }
  0x64   :  { %1184 = vmatpush3.bf16.msra.mxu1 %v1363_v12 }
 0x106   :  { %v297_v20 = vpop.f32.mrb[0].mxu1 }
 0x107   :  { %v298_v21 = vadd.f32 %v297_v20, %v80_v18  ;;  %v299_v22 = vpop.f32.mrb[1].mxu1  ;;  %v1341_v20 = vld [vmem:[#allocation2 + $0x1b4] ss:$8 sps:$4 sm:$0xff]  }
 0x108   :  { %v300_v23 = vadd.f32 %v299_v22, %v84_v19  ;;  %v301_v24 = vpop.f32.mrb[2].mxu1  ;;  %v1344_v22 = vld [vmem:[#allocation2 + $0x1c4] ss:$8 sps:$4 sm:$0xff]  }
 0x109   :  { %v349_v25 = vmul.f32 0.01, %v298_v21  ;;  %v302_v26 = vadd.f32 %v301_v24, %v80_v18  ;;  %v303_v27 = vpop.f32.mrb[3].mxu1  ;;  %v1338_v18 = vld [vmem:[#allocation2 + $0x1a4] ss:$8 sps:$4 sm:$0xff]  }
 0x10a   :  { %v350_v28 = vmul.f32 0.01, %v300_v23  ;;  %v304_v29 = vadd.f32 %v303_v27, %v84_v19  ;;  %v1336_v19 = vld [vmem:[#allocation2 + $0x1a0] ss:$8 sps:$4 sm:$0xff]   ;;  %v1347_v24 = vld [vmem:[#allocation2 + $0x1d4] ss:$8 sps:$4 sm:$0xff]  }
 0x10b   :  { %v353_v30 = vmul.f32 0.01, %v302_v26  ;;  %v357_v32 = vmax.f32 %v298_v21, %v349_v25  ;;  %v1339_v21 = vld [vmem:[#allocation2 + $0x1b0] ss:$8 sps:$4 sm:$0xff]   ;;  %v1348_v27 = vld [vmem:[#allocation2 + $0x1e0] ss:$8 sps:$4 sm:$0xff]  }
 0x10c   :  { %v354_v31 = vmul.f32 0.01, %v304_v29  ;;  %v358_v34 = vmax.f32 %v300_v23, %v350_v28  ;;  %v1342_v23 = vld [vmem:[#allocation2 + $0x1c0] ss:$8 sps:$4 sm:$0xff]   ;;  %v1345_v25 = vld [vmem:[#allocation2 + $0x1d0] ss:$8 sps:$4 sm:$0xff]  }
 0x10d   :  { %v361_v33 = vmax.f32 %v302_v26, %v353_v30  ;;  %v1350_v26 = vld [vmem:[#allocation2 + $0x1e4] ss:$8 sps:$4 sm:$0xff]   ;;  %v1353_v28 = vld [vmem:[#allocation2 + $0x1f4] ss:$8 sps:$4 sm:$0xff]  }
 0x10e   :  { %v362_v35 = vmax.f32 %v304_v29, %v354_v31  ;;  %v1351_v29 = vld [vmem:[#allocation2 + $0x1f0] ss:$8 sps:$4 sm:$0xff]   ;;  %v1364_v30 = vld [vmem:[%s1635_s5 + $0x68] sm:$0xff]  }
 0x10f   :  { %v365_v36 = vpack.c.bf16 %v361_v33, %v357_v32  ;;  %v1365_v31 = vld [vmem:[%s1635_s5 + $0x28] sm:$0xff]   ;;  %1185 = vmatprep.subr.bf16.mxu1 %v1364_v30  ;;  %v1366_v32 = vld [vmem:[%s1635_s5 + $0x70] sm:$0xff]  }
 0x110   :  { %v366_v37 = vpack.c.bf16 %v362_v35, %v358_v34  ;;  %1186 = vmatpush3.bf16.msra.mxu1 %v1365_v31  ;;  %v1367_v33 = vld [vmem:[%s1635_s5 + $0x30] sm:$0xff]   ;;  %v1368_v34 = vld [vmem:[%s1635_s5 + $0x78] sm:$0xff]  }
 0x111   :  { %1187 = vmatprep.subr.bf16.mxu1 %v1366_v32  ;;  %v1369_v35 = vld [vmem:[%s1635_s5 + $0x38] sm:$0xff]  }
 0x112   :  { %797 = vmatprep.mubr.bf16.mxu0 %v366_v37 }
 0x113   :  { %798 = vmatmul.mubr.bf16.vlgmr.msra.gmra.mrb[0].mxu0 %v365_v36  ;;  %v433_v36 = vld [vmem:[%s1634_s4] sm:$0x3] }
 0x114   :  { %809 = vmatpush1.bf16.msra.mxu0 %v1306_v38  ;;  %1188 = vmatpush3.bf16.msra.mxu1 %v1367_v33  ;;  %v438_v37 = vrot.slane %v433_v36, %v79_v15  ;;  %v442_v38 = vrot.slane %v433_v36, %v83_v17  ;;  %v1154_v17 = vld [vmem:[%s1636_s6] ss:$0 sm:$0xff] }
 0x115   :  { %810 = vmatprep.subr.bf16.mxu0 %v1311_v39  ;;  %1189 = vmatprep.subr.bf16.mxu1 %v1368_v34 }
 0x118   :  { %811 = vmatpush1.bf16.msra.mxu0 %v1309_v40  ;;  %1190 = vmatpush3.bf16.msra.mxu1 %v1369_v35 }
 0x119   :  { %812 = vmatprep.subr.bf16.mxu0 %v1314_v41 }
 0x11c   :  { %813 = vmatpush1.bf16.msra.mxu0 %v1312_v42 }
 0x11d   :  { %814 = vmatprep.subr.bf16.mxu0 %v1317_v43 }
 0x120   :  { %815 = vmatpush1.bf16.msra.mxu0 %v1315_v44 }
 0x121   :  { %816 = vmatprep.subr.bf16.mxu0 %v1320_v45 }
 0x124   :  { %817 = vmatpush1.bf16.msra.mxu0 %v1318_v47 }
 0x125   :  { %818 = vmatprep.subr.bf16.mxu0 %v1323_v49 }
 0x126   :  { %v340_v54 = vpop.f32.mrb[4].mxu1 }
 0x127   :  { %v341_v55 = vadd.f32 %v340_v54, %v88_v50  ;;  %v342_v56 = vpop.f32.mrb[5].mxu1 }
 0x128   :  { %819 = vmatpush1.bf16.msra.mxu0 %v1321_v51  ;;  %v343_v58 = vadd.f32 %v342_v56, %v92_v52  ;;  %v344_v59 = vpop.f32.mrb[6].mxu1 }
 0x129   :  { %820 = vmatprep.subr.bf16.mxu0 %v1326_v53  ;;  %v351_v61 = vmul.f32 0.01, %v341_v55  ;;  %v345_v62 = vadd.f32 %v344_v59, %v88_v50  ;;  %v346_v63 = vpop.f32.mrb[7].mxu1 }
 0x12a   :  { %v352_v0 = vmul.f32 0.01, %v343_v58  ;;  %v347_v1 = vadd.f32 %v346_v63, %v92_v52 }
 0x12b   :  { %v359_v2 = vmax.f32 %v341_v55, %v351_v61  ;;  %v355_v3 = vmul.f32 0.01, %v345_v62 }
 0x12c   :  { %821 = vmatpush1.bf16.msra.mxu0 %v1324_v57  ;;  %v360_v5 = vmax.f32 %v343_v58, %v352_v0  ;;  %v356_v6 = vmul.f32 0.01, %v347_v1 }
 0x12d   :  { %822 = vmatprep.subr.bf16.mxu0 %v1329_v60  ;;  %v363_v8 = vmax.f32 %v345_v62, %v355_v3 }
 0x12e   :  { %v364_v9 = vmax.f32 %v347_v1, %v356_v6 }
 0x12f   :  { %v367_v10 = vpack.c.bf16 %v363_v8, %v359_v2 }
 0x130   :  { %823 = vmatpush1.bf16.msra.mxu0 %v1327_v4  ;;  %v368_v12 = vpack.c.bf16 %v364_v9, %v360_v5 }
 0x131   :  { %824 = vmatprep.subr.bf16.mxu0 %v1332_v7 }
 0x132   :  { %840 = vmatprep.mubr.bf16.mxu0 %v368_v12 }
 0x134   :  { %825 = vmatpush1.bf16.msra.mxu0 %v1330_v11 }
 0x135   :  { %826 = vmatprep.subr.bf16.mxu0 %v1335_v13 }
 0x138   :  { %827 = vmatpush1.bf16.msra.mxu0 %v1333_v16 }
 0x139   :  { %828 = vmatprep.subr.bf16.mxu0 %v1338_v18 }
 0x13c   :  { %829 = vmatpush1.bf16.msra.mxu0 %v1336_v19 }
 0x13d   :  { %830 = vmatprep.subr.bf16.mxu0 %v1341_v20 }
 0x140   :  { %831 = vmatpush1.bf16.msra.mxu0 %v1339_v21 }
 0x141   :  { %832 = vmatprep.subr.bf16.mxu0 %v1344_v22 }
 0x144   :  { %833 = vmatpush1.bf16.msra.mxu0 %v1342_v23 }
 0x145   :  { %834 = vmatprep.subr.bf16.mxu0 %v1347_v24 }
 0x148   :  { %835 = vmatpush1.bf16.msra.mxu0 %v1345_v25 }
 0x149   :  { %836 = vmatprep.subr.bf16.mxu0 %v1350_v26 }
 0x14c   :  { %837 = vmatpush1.bf16.msra.mxu0 %v1348_v27 }
 0x14d   :  { %838 = vmatprep.subr.bf16.mxu0 %v1353_v28 }
 0x150   :  { %839 = vmatpush1.bf16.msra.mxu0 %v1351_v29 }
 0x153   :  { %841 = vmatmul.mubr.bf16.vlgmr.msra.gmra.mrb[0].mxu0 %v367_v10 }
 0x226   :  { %v842_v39 = vpop.f32.mrb[0].mxu0 }
 0x227   :  { %v1197_v40 = vadd.f32 %v842_v39, %v438_v37  ;;  %v844_v41 = vpop.f32.mrb[1].mxu0 }
 0x228   :  { %v1198_v42 = vadd.f32 %v844_v41, %v442_v38  ;;  %v846_v43 = vpop.f32.mrb[2].mxu0 }
 0x229   :  { %v851_v44 = vmul.f32 0.01, %v1197_v40  ;;  %v1199_v45 = vadd.f32 %v846_v43, %v438_v37  ;;  %v848_v46 = vpop.f32.mrb[3].mxu0 }
 0x22a   :  { %v852_v47 = vmul.f32 0.01, %v1198_v42  ;;  %v1200_v48 = vadd.f32 %v848_v46, %v442_v38 }
 0x22b   :  { %v853_v49 = vmul.f32 0.01, %v1199_v45  ;;  %v855_v51 = vmax.f32 %v1197_v40, %v851_v44 }
 0x22c   :  { %v854_v50 = vmul.f32 0.01, %v1200_v48  ;;  %v856_v53 = vmax.f32 %v1198_v42, %v852_v47 }
 0x22d   :  { %v857_v52 = vmax.f32 %v1199_v45, %v853_v49 }
 0x22e   :  { %v858_v54 = vmax.f32 %v1200_v48, %v854_v50 }
 0x22f   :  { %v859_v15 = vpack.c.bf16 %v857_v52, %v855_v51 }
 0x230   :  { %v860_v55 = vpack.c.bf16 %v858_v54, %v856_v53 }
 0x232   :  { %1028 = vmatprep.mubr.bf16.mxu1 %v860_v55 }
 0x233   :  { %1029 = vmatmul.mubr.bf16.vlgmr.msra.gmra.mrb[8].mxu1 %v859_v15 }
 0x306   :  { %v1191_v14 = vpop.f32.mrb[8].mxu1 }
 0x307   :  { %v1192_v56 = vpop.f32.mrb[9].mxu1 }
 0x308   :  { %v1193_v57 = vadd.f32 %v1192_v56, %v1191_v14  ;;  %v1194_v58 = vpop.f32.mrb[10].mxu1 }
 0x309   :  { %v1195_v59 = vpop.f32.mrb[11].mxu1 }
 0x30a   :  { %v1031_v60 = vadd.f32 %v1193_v57, %v1154_v17  ;;  %v1196_v61 = vadd.f32 %v1195_v59, %v1194_v58 }
 0x30c   :  { %v1037_v62 = vmul.f32 0.01, %v1031_v60  ;;  %v1034_v63 = vadd.f32 %v1196_v61, %v1154_v17 }
 0x30e   :  { %v1039_v0 = vmax.f32 %v1031_v60, %v1037_v62  ;;  %v1038_v1 = vmul.f32 0.01, %v1034_v63 }
 0x310   :  { %v1173_v2 = vpack.c.bf16 %v1039_v0, %v1039_v0  ;;  %v1040_v3 = vmax.f32 %v1034_v63, %v1038_v1 }
 0x312   :  { %1050 = vst.msk [vmem:[%s1637_s7] sm:$0xf] %vm1049_vm0, %v1173_v2  ;;  %v1174_v4 = vpack.c.bf16 %v1040_v3, %v1040_v3 }
 0x314   :  { %1051 = vst.msk [vmem:[%s1637_s7 + $0x4] sm:$0xf] %vm1049_vm0, %v1174_v4 }
 0x315   :  { %1056 = vsyncpa [#allocation3], 1 }

</bundles_post_ra>
